<compile_context>
chip_gen: v7x
topology: tpu7x:2x2x1
jax: 0.10.0
libtpu: 0.0.40
codegen_flags: <defaults>
</compile_context>

<pallas_src>
import math

import jax
import jax.numpy as jnp
import numpy as np
from jax.experimental import pallas as pl
from jax.experimental.pallas import tpu as pltpu

_LANE = 128
_VMEM_TILE_BUDGET = 28 * 1024 * 1024   # working-set target used for TL / TB sizing
_VMEM_LIMIT_BYTES = 48 * 1024 * 1024   # explicit scoped-VMEM request (< v7x 64 MiB)


def _per_lane_col_bytes(Cin, Cout, K, compute_bytes):
    """Rough per-lane-column VMEM footprint of one grid step (for tiling only)."""
    io = 2 * Cin * compute_bytes + 2 * Cout * compute_bytes        # x / out, double-buffered
    im2col = (K * Cin + K * Cout + Cin + Cout) * compute_bytes     # xw, hw, x_ext, h1_ext temps
    inter = 5 * Cout * 4                                           # h1res(2x) + h1 + h2 + out (f32)
    return io + im2col + inter


def _choose_time_tile(L_pad, P, per_col, budget):
    """Largest lane-dense divisor of L_pad (multiple of 128, >= halo P) within budget."""
    m_total = L_pad // _LANE
    fits, fallback = None, None
    for m in range(1, m_total + 1):
        if m_total % m:
            continue
        tl = _LANE * m
        if tl < P:
            continue
        if fallback is None:
            fallback = tl
        if tl * per_col <= budget:
            fits = tl
    return fits if fits is not None else fallback


def _choose_batch_stack(B, TL, per_col, budget):
    """Largest divisor of B to stack on the lane axis, keeping >= 2 batch grid rows
    (so the 'parallel' batch axis can still be sharded across v7x TensorCores)."""
    best = 1
    for tb in range(1, min(B, 8) + 1):
        if B % tb:
            continue
        if B >= 2 and B // tb < 2:
            continue
        if tb * TL * per_col > budget:
            continue
        best = tb
    return best


def _make_kernel(K, d, P, TL, TB, Cin, Cout, compute_dtype):
    def kernel(x_ref, w1s_ref, b1_ref, w2_ref, b2_ref, bd_ref,
               o_ref, xc_ref, h1c_ref):
        # x_ref : (TB, Cin, TL) current time tile for TB batch rows (NCL layout)
        # o_ref : (TB, Cout, TL)
        # xc_ref / h1c_ref : (TB, Cin, P) / (TB, Cout, P) per-row causal-halo carries.
        # The time grid axis MUST stay innermost + sequential ("arbitrary"): the
        # carries implement the causal left context across time tiles.
        t = pl.program_id(1)

        @pl.when(t == 0)
        def _():
            # Causal left zero-pad for the first time tile of each batch group.
            xc_ref[...] = jnp.zeros_like(xc_ref)
            h1c_ref[...] = jnp.zeros_like(h1c_ref)

        x_rows = [x_ref[i] for i in range(TB)]                           # (Cin, TL) each
        x_ext = [jnp.concatenate([xc_ref[i], x_rows[i]], axis=1)
                 for i in range(TB)]                                     # (Cin, P+TL)

        # im2col: tap-major row blocks, batch-row-major lane columns -> (K*Cin, TB*TL)
        # TODO(synk): at large channel counts switch these unaligned lane slices to
        # pltpu.roll-based shifts / a persistent VMEM staging buffer.
        xw = jnp.concatenate(
            [jnp.concatenate([x_ext[i][:, k * d:k * d + TL] for i in range(TB)], axis=1)
             for k in range(K)], axis=0)

        # conv1 + fused 1x1 downsample: one MXU matmul, f32 accumulation.
        h1res = jnp.dot(w1s_ref[...], xw, preferred_element_type=jnp.float32)  # (2*Cout, TB*TL)
        h1 = jnp.maximum(h1res[:Cout] + b1_ref[...], 0.0)               # relu1 (+dropout1=id)
        res = h1res[Cout:]                                               # downsample, pre-bias
        h1c = h1.astype(compute_dtype)                                   # conv2 operand / carry

        # conv2: same fused-tap form, halo from the per-row carry.
        h1_ext = [jnp.concatenate([h1c_ref[i], h1c[:, i * TL:(i + 1) * TL]], axis=1)
                  for i in range(TB)]                                    # (Cout, P+TL)
        hw = jnp.concatenate(
            [jnp.concatenate([h1_ext[i][:, k * d:k * d + TL] for i in range(TB)], axis=1)
             for k in range(K)], axis=0)                                 # (K*Cout, TB*TL)

        h2 = jnp.dot(w2_ref[...], hw, preferred_element_type=jnp.float32)
        h2 = jnp.maximum(h2 + b2_ref[...], 0.0)                          # relu2 (+dropout2=id)

        out = jnp.maximum(h2 + res + bd_ref[...], 0.0).astype(o_ref.dtype)

        for i in range(TB):
            o_ref[i] = out[:, i * TL:(i + 1) * TL]                       # lane-dense store
            # Carry the last P time columns of each row into the next time tile.
            xc_ref[i] = x_rows[i][:, TL - P:TL]
            h1c_ref[i] = h1c[:, i * TL + TL - P:(i + 1) * TL]

    return kernel


def temporal_block(x, w1_oik, b1, w2_oik, b2, wd_oik, bd, *,
                   dilation, compute_dtype=jnp.bfloat16,
                   time_tile=None, batch_stack=None):
    """Fused TemporalBlock forward.

    x      : (B, Cin, L) float32, PyTorch NCL layout (consumed directly).
    w*_oik : PyTorch Conv1d weights (Cout, Cin_or_Cout, K) with weight_norm folded in.
    wd_oik : (Cout, Cin, 1) downsample weight, or None for the identity residual.
    b*     : (Cout,) biases.
    Returns (B, Cout, L) in `compute_dtype`.
    """
    B, Cin, L = x.shape
    Cout, _, K = w1_oik.shape
    d = dilation
    P = (K - 1) * d
    assert P >= 1, "kernel_size must be >= 2 (causal halo carry needs P >= 1)"

    if wd_oik is None:
        assert Cin == Cout, "identity residual requires n_inputs == n_outputs"
        wd = jnp.eye(Cout, Cin, dtype=jnp.float32)
        bd = jnp.zeros((Cout,), jnp.float32) if bd is None else bd
    else:
        wd = wd_oik[:, :, 0]                                             # (Cout, Cin)

    cdt = jnp.dtype(compute_dtype)
    per_col = _per_lane_col_bytes(Cin, Cout, K, cdt.itemsize)

    # Lane-dense padded sequence length, then VMEM-budget-aware tiling.
    L_pad = _LANE * math.ceil(max(L, P) / _LANE)
    TL = time_tile if time_tile is not None else _choose_time_tile(
        L_pad, P, per_col, _VMEM_TILE_BUDGET)
    assert L_pad % TL == 0 and TL % _LANE == 0 and TL >= P
    TB = batch_stack if batch_stack is not None else _choose_batch_stack(
        B, TL, per_col, _VMEM_TILE_BUDGET)
    assert B % TB == 0

    # One-time weight prep: tap-major fused layout; 1x1 downsample stacked under
    # conv1 (the tap-(K-1) column block of the im2col equals the unshifted x tile).
    w1f = jnp.transpose(w1_oik, (0, 2, 1)).reshape(Cout, K * Cin)        # [:, k*Cin+c]=w1[o,c,k]
    w2f = jnp.transpose(w2_oik, (0, 2, 1)).reshape(Cout, K * Cout)
    wd_row = jnp.concatenate(
        [jnp.zeros((Cout, (K - 1) * Cin), jnp.float32), wd], axis=1)
    w1s = jnp.concatenate([w1f, wd_row], axis=0).astype(cdt)             # (2*Cout, K*Cin)
    w2c = w2f.astype(cdt)

    b1c = b1.reshape(Cout, 1).astype(jnp.float32)
    b2c = b2.reshape(Cout, 1).astype(jnp.float32)
    bdc = bd.reshape(Cout, 1).astype(jnp.float32)

    xp = x
    if L_pad != L:
        xp = jnp.pad(xp, ((0, 0), (0, 0), (0, L_pad - L)))               # causal -> safe
    xp = xp.astype(cdt)

    kernel = _make_kernel(K, d, P, TL, TB, Cin, Cout, cdt)

    out = pl.pallas_call(
        kernel,
        out_shape=jax.ShapeDtypeStruct((B, Cout, L_pad), cdt),
        grid_spec=pltpu.PrefetchScalarGridSpec(
            num_scalar_prefetch=0,
            grid=(B // TB, L_pad // TL),
            in_specs=[
                pl.BlockSpec((TB, Cin, TL), lambda g, t: (g, 0, t)),     # x tile
                pl.BlockSpec((2 * Cout, K * Cin), lambda g, t: (0, 0)),  # conv1+downsample (resident)
                pl.BlockSpec((Cout, 1), lambda g, t: (0, 0)),            # b1
                pl.BlockSpec((Cout, K * Cout), lambda g, t: (0, 0)),     # conv2 (resident)
                pl.BlockSpec((Cout, 1), lambda g, t: (0, 0)),            # b2
                pl.BlockSpec((Cout, 1), lambda g, t: (0, 0)),            # downsample bias
            ],
            out_specs=pl.BlockSpec((TB, Cout, TL), lambda g, t: (g, 0, t)),
            scratch_shapes=[
                pltpu.VMEM((TB, Cin, P), cdt),    # x halo carry (per stacked row)
                pltpu.VMEM((TB, Cout, P), cdt),   # h1 halo carry (per stacked row)
            ],
        ),
        compiler_params=pltpu.CompilerParams(
            dimension_semantics=("parallel", "arbitrary"),
            vmem_limit_bytes=_VMEM_LIMIT_BYTES),
    )(xp, w1s, b1c, w2c, b2c, bdc)

    if L_pad != L:
        out = out[:, :, :L]
    return out


def _ref_block(x, w1_oik, b1, w2_oik, b2, wd_oik, bd, *, dilation, padding,
               round_dtype=None):
    """Plain-JAX reference (lax.conv_general_dilated), NCL / OIK layouts.
    round_dtype mimics the kernel's mixed-precision path (operands rounded to bf16,
    f32 accumulation) so the comparison stays tight."""
    def rnd(a):
        return a if round_dtype is None else a.astype(round_dtype).astype(jnp.float32)

    def cconv(inp, w, b, pad, dil):
        y = jax.lax.conv_general_dilated(
            rnd(inp), rnd(w), window_strides=(1,), padding=[(pad, 0)],
            rhs_dilation=(dil,), dimension_numbers=('NCH', 'OIH', 'NCH'))
        return y + b[None, :, None]

    h1 = jnp.maximum(cconv(x, w1_oik, b1, padding, dilation), 0.0)
    h2 = jnp.maximum(cconv(h1, w2_oik, b2, padding, dilation), 0.0)
    res = cconv(x, wd_oik, bd, 0, 1)
    return rnd(jnp.maximum(h2 + res, 0.0))


def _weight_norm(v):
    # nn.utils.weight_norm: w = g * v / ||v|| over all dims but dim 0; g is
    # initialized to ||v||, so the effective weight at init equals v.
    norm = jnp.sqrt(jnp.sum(v * v, axis=(1, 2), keepdims=True))
    return norm * v / norm


if __name__ == "__main__":
    def make_params(ks, Cin, Cout, K):
        w1 = _weight_norm(0.01 * jax.random.normal(ks[0], (Cout, Cin, K), jnp.float32))
        w2 = _weight_norm(0.01 * jax.random.normal(ks[1], (Cout, Cout, K), jnp.float32))
        wd = 0.01 * jax.random.normal(ks[2], (Cout, Cin, 1), jnp.float32)
        b1 = jax.random.uniform(ks[3], (Cout,), jnp.float32, -0.1, 0.1)
        b2 = jax.random.uniform(ks[4], (Cout,), jnp.float32, -0.1, 0.1)
        bd = jax.random.uniform(ks[5], (Cout,), jnp.float32, -0.1, 0.1)
        return w1, b1, w2, b2, wd, bd

    # --- test 1: f32 compute, small module-consistent shapes, exact check --------
    B, Cin, Cout, L, K, d = 2, 4, 8, 128, 3, 2
    ks = jax.random.split(jax.random.PRNGKey(0), 7)
    x = jax.random.normal(ks[0], (B, Cin, L), jnp.float32)
    w1, b1, w2, b2, wd, bd = make_params(ks[1:], Cin, Cout, K)

    out = temporal_block(x, w1, b1, w2, b2, wd, bd, dilation=d,
                         compute_dtype=jnp.float32)
    out = jax.block_until_ready(out)
    ref = _ref_block(x, w1, b1, w2, b2, wd, bd, dilation=d, padding=(K - 1) * d)
    assert out.shape == (B, Cout, L), out.shape
    np.testing.assert_allclose(np.asarray(out), np.asarray(ref),
                               rtol=1e-4, atol=1e-5)

    # --- test 2: bf16 compute, ragged L (200 -> pad 256), multi time tile,
    #             batch-stacked lanes (TB=2) -------------------------------------
    B, Cin, Cout, L, K, d = 4, 8, 16, 200, 3, 4
    ks = jax.random.split(jax.random.PRNGKey(1), 7)
    x = jax.random.normal(ks[0], (B, Cin, L), jnp.float32)
    w1, b1, w2, b2, wd, bd = make_params(ks[1:], Cin, Cout, K)

    out = temporal_block(x, w1, b1, w2, b2, wd, bd, dilation=d,
                         compute_dtype=jnp.bfloat16, time_tile=128)
    out = jax.block_until_ready(out)
    ref = _ref_block(x, w1, b1, w2, b2, wd, bd, dilation=d, padding=(K - 1) * d,
                     round_dtype=jnp.bfloat16)
    assert out.shape == (B, Cout, L), out.shape
    np.testing.assert_allclose(np.asarray(out.astype(jnp.float32)), np.asarray(ref),
                               rtol=2e-2, atol=2e-4)

    print("KERNEL_OK")
</pallas_src>

<mosaic_0001>
module attributes {stable_mosaic.version = 11 : i64} {
  func.func @kernel(%arg0: i32, %arg1: i32, %arg2: memref<1x4x128xf32, #tpu.memory_space<vmem>>, %arg3: memref<16x12xf32, #tpu.memory_space<vmem>>, %arg4: memref<8x1xf32, #tpu.memory_space<vmem>>, %arg5: memref<8x24xf32, #tpu.memory_space<vmem>>, %arg6: memref<8x1xf32, #tpu.memory_space<vmem>>, %arg7: memref<8x1xf32, #tpu.memory_space<vmem>>, %arg8: memref<1x8x128xf32, #tpu.memory_space<vmem>>, %arg9: memref<1x4x4xf32, #tpu.memory_space<vmem>>, %arg10: memref<1x8x4xf32, #tpu.memory_space<vmem>>) attributes {dimension_semantics = [#tpu.dimension_semantics<parallel>, #tpu.dimension_semantics<arbitrary>], iteration_bounds = array<i64: 2, 1>, scalar_prefetch = 0 : i64, scratch_operands = 2 : i64, tpu.core_type = #tpu.core_type<tc>, window_params = [{transform_indices = @transform_0, window_bounds = array<i64: 1, 4, 128>}, {pipeline_mode = #tpu.pipeline_mode<synchronous>, transform_indices = @transform_1, window_bounds = array<i64: 16, 12>}, {pipeline_mode = #tpu.pipeline_mode<synchronous>, transform_indices = @transform_2, window_bounds = array<i64: 8, 1>}, {pipeline_mode = #tpu.pipeline_mode<synchronous>, transform_indices = @transform_3, window_bounds = array<i64: 8, 24>}, {pipeline_mode = #tpu.pipeline_mode<synchronous>, transform_indices = @transform_4, window_bounds = array<i64: 8, 1>}, {pipeline_mode = #tpu.pipeline_mode<synchronous>, transform_indices = @transform_5, window_bounds = array<i64: 8, 1>}, {transform_indices = @transform_6, window_bounds = array<i64: 1, 8, 128>}]} {
    %c0_i32 = arith.constant 0 : i32
    %0 = arith.cmpi eq, %arg1, %c0_i32 : i32
    %1 = arith.extui %0 : i1 to i32
    %c0_i32_0 = arith.constant 0 : i32
    %2 = arith.cmpi ne, %1, %c0_i32_0 : i32
    scf.if %2 {
      %cst_32 = arith.constant 0.000000e+00 : f32
      %52 = vector.broadcast %cst_32 : f32 to vector<1x4x4xf32>
      %c0_33 = arith.constant 0 : index
      %c0_34 = arith.constant 0 : index
      %c0_35 = arith.constant 0 : index
      %53 = vector.load %arg9[%c0_33, %c0_34, %c0_35] : memref<1x4x4xf32, #tpu.memory_space<vmem>>, vector<1x4x4xf32>
      tpu.vector_store %arg9[%c0_33, %c0_34, %c0_35], %52 {strides = array<i32>} : memref<1x4x4xf32, #tpu.memory_space<vmem>>, vector<1x4x4xf32>,
      %cst_36 = arith.constant 0.000000e+00 : f32
      %54 = vector.broadcast %cst_36 : f32 to vector<1x8x4xf32>
      %c0_37 = arith.constant 0 : index
      %c0_38 = arith.constant 0 : index
      %c0_39 = arith.constant 0 : index
      %55 = vector.load %arg10[%c0_37, %c0_38, %c0_39] : memref<1x8x4xf32, #tpu.memory_space<vmem>>, vector<1x8x4xf32>
      tpu.vector_store %arg10[%c0_37, %c0_38, %c0_39], %54 {strides = array<i32>} : memref<1x8x4xf32, #tpu.memory_space<vmem>>, vector<1x8x4xf32>,
    } else {
    }
    %c0 = arith.constant 0 : index
    %c0_1 = arith.constant 0 : index
    %c0_2 = arith.constant 0 : index
    %3 = vector.load %arg2[%c0, %c0_1, %c0_2] : memref<1x4x128xf32, #tpu.memory_space<vmem>>, vector<1x4x128xf32>
    %4 = vector.shape_cast %3 : vector<1x4x128xf32> to vector<4x128xf32>
    %c0_3 = arith.constant 0 : index
    %c0_4 = arith.constant 0 : index
    %c0_5 = arith.constant 0 : index
    %5 = vector.load %arg9[%c0_3, %c0_4, %c0_5] : memref<1x4x4xf32, #tpu.memory_space<vmem>>, vector<1x4x4xf32>
    %6 = vector.shape_cast %5 : vector<1x4x4xf32> to vector<4x4xf32>
    %7 = tpu.concatenate %6, %4 in 1 : vector<4x4xf32>, vector<4x128xf32> -> vector<4x132xf32>
    %8 = vector.extract_strided_slice %7 {offsets = [0, 0], sizes = [4, 128], strides = [1, 1]} : vector<4x132xf32> to vector<4x128xf32>
    %9 = vector.extract_strided_slice %7 {offsets = [0, 2], sizes = [4, 128], strides = [1, 1]} : vector<4x132xf32> to vector<4x128xf32>
    %10 = vector.extract_strided_slice %7 {offsets = [0, 4], sizes = [4, 128], strides = [1, 1]} : vector<4x132xf32> to vector<4x128xf32>
    %11 = tpu.concatenate %8, %9, %10 in 0 : vector<4x128xf32>, vector<4x128xf32>, vector<4x128xf32> -> vector<12x128xf32>
    %c0_6 = arith.constant 0 : index
    %c0_7 = arith.constant 0 : index
    %12 = vector.load %arg3[%c0_6, %c0_7] : memref<16x12xf32, #tpu.memory_space<vmem>>, vector<16x12xf32>
    %cst = arith.constant dense<0.000000e+00> : vector<16x128xf32>
    %13 = tpu.matmul %12, %11, %cst {dimension_numbers = #tpu.dot_dimension_numbers<[1], [0], [0], [1], [0, 0, 1, 1], [], []>} : vector<16x12xf32>, vector<12x128xf32>, vector<16x128xf32> -> vector<16x128xf32>
    %14 = vector.extract_strided_slice %13 {offsets = [0, 0], sizes = [8, 128], strides = [1, 1]} : vector<16x128xf32> to vector<8x128xf32>
    %c0_8 = arith.constant 0 : index
    %c0_9 = arith.constant 0 : index
    %15 = vector.load %arg4[%c0_8, %c0_9] : memref<8x1xf32, #tpu.memory_space<vmem>>, vector<8x1xf32>
    %16 = vector.broadcast %15 : vector<8x1xf32> to vector<8x128xf32>
    %17 = arith.addf %14, %16 : vector<8x128xf32>
    %cst_10 = arith.constant 0.000000e+00 : f32
    %18 = vector.broadcast %cst_10 : f32 to vector<8x128xf32>
    %19 = arith.maximumf %17, %18 : vector<8x128xf32>
    %20 = vector.extract_strided_slice %13 {offsets = [8, 0], sizes = [8, 128], strides = [1, 1]} : vector<16x128xf32> to vector<8x128xf32>
    %c0_11 = arith.constant 0 : index
    %c0_12 = arith.constant 0 : index
    %c0_13 = arith.constant 0 : index
    %21 = vector.load %arg10[%c0_11, %c0_12, %c0_13] : memref<1x8x4xf32, #tpu.memory_space<vmem>>, vector<1x8x4xf32>
    %22 = vector.shape_cast %21 : vector<1x8x4xf32> to vector<8x4xf32>
    %23 = tpu.concatenate %22, %19 in 1 : vector<8x4xf32>, vector<8x128xf32> -> vector<8x132xf32>
    %24 = vector.extract_strided_slice %23 {offsets = [0, 0], sizes = [8, 128], strides = [1, 1]} : vector<8x132xf32> to vector<8x128xf32>
    %25 = vector.extract_strided_slice %23 {offsets = [0, 2], sizes = [8, 128], strides = [1, 1]} : vector<8x132xf32> to vector<8x128xf32>
    %26 = vector.extract_strided_slice %23 {offsets = [0, 4], sizes = [8, 128], strides = [1, 1]} : vector<8x132xf32> to vector<8x128xf32>
    %27 = tpu.concatenate %24, %25, %26 in 0 : vector<8x128xf32>, vector<8x128xf32>, vector<8x128xf32> -> vector<24x128xf32>
    %c0_14 = arith.constant 0 : index
    %c0_15 = arith.constant 0 : index
    %28 = vector.load %arg5[%c0_14, %c0_15] : memref<8x24xf32, #tpu.memory_space<vmem>>, vector<8x24xf32>
    %cst_16 = arith.constant dense<0.000000e+00> : vector<8x128xf32>
    %29 = tpu.matmul %28, %27, %cst_16 {dimension_numbers = #tpu.dot_dimension_numbers<[1], [0], [0], [1], [0, 0, 1, 1], [], []>} : vector<8x24xf32>, vector<24x128xf32>, vector<8x128xf32> -> vector<8x128xf32>
    %c0_17 = arith.constant 0 : index
    %c0_18 = arith.constant 0 : index
    %30 = vector.load %arg6[%c0_17, %c0_18] : memref<8x1xf32, #tpu.memory_space<vmem>>, vector<8x1xf32>
    %31 = vector.broadcast %30 : vector<8x1xf32> to vector<8x128xf32>
    %32 = arith.addf %29, %31 : vector<8x128xf32>
    %cst_19 = arith.constant 0.000000e+00 : f32
    %33 = vector.broadcast %cst_19 : f32 to vector<8x128xf32>
    %34 = arith.maximumf %32, %33 : vector<8x128xf32>
    %35 = arith.addf %34, %20 : vector<8x128xf32>
    %c0_20 = arith.constant 0 : index
    %c0_21 = arith.constant 0 : index
    %36 = vector.load %arg7[%c0_20, %c0_21] : memref<8x1xf32, #tpu.memory_space<vmem>>, vector<8x1xf32>
    %37 = vector.broadcast %36 : vector<8x1xf32> to vector<8x128xf32>
    %38 = arith.addf %35, %37 : vector<8x128xf32>
    %cst_22 = arith.constant 0.000000e+00 : f32
    %39 = vector.broadcast %cst_22 : f32 to vector<8x128xf32>
    %40 = arith.maximumf %38, %39 : vector<8x128xf32>
    %c0_23 = arith.constant 0 : index
    %c0_24 = arith.constant 0 : index
    %c0_25 = arith.constant 0 : index
    %41 = vector.load %arg8[%c0_23, %c0_24, %c0_25] : memref<1x8x128xf32, #tpu.memory_space<vmem>>, vector<1x8x128xf32>
    %42 = vector.shape_cast %41 : vector<1x8x128xf32> to vector<8x128xf32>
    %43 = vector.shape_cast %40 : vector<8x128xf32> to vector<1x8x128xf32>
    tpu.vector_store %arg8[%c0_23, %c0_24, %c0_25], %43 {strides = array<i32>} : memref<1x8x128xf32, #tpu.memory_space<vmem>>, vector<1x8x128xf32>,
    %44 = vector.extract_strided_slice %4 {offsets = [0, 124], sizes = [4, 4], strides = [1, 1]} : vector<4x128xf32> to vector<4x4xf32>
    %c0_26 = arith.constant 0 : index
    %c0_27 = arith.constant 0 : index
    %c0_28 = arith.constant 0 : index
    %45 = vector.load %arg9[%c0_26, %c0_27, %c0_28] : memref<1x4x4xf32, #tpu.memory_space<vmem>>, vector<1x4x4xf32>
    %46 = vector.shape_cast %45 : vector<1x4x4xf32> to vector<4x4xf32>
    %47 = vector.shape_cast %44 : vector<4x4xf32> to vector<1x4x4xf32>
    tpu.vector_store %arg9[%c0_26, %c0_27, %c0_28], %47 {strides = array<i32>} : memref<1x4x4xf32, #tpu.memory_space<vmem>>, vector<1x4x4xf32>,
    %48 = vector.extract_strided_slice %19 {offsets = [0, 124], sizes = [8, 4], strides = [1, 1]} : vector<8x128xf32> to vector<8x4xf32>
    %c0_29 = arith.constant 0 : index
    %c0_30 = arith.constant 0 : index
    %c0_31 = arith.constant 0 : index
    %49 = vector.load %arg10[%c0_29, %c0_30, %c0_31] : memref<1x8x4xf32, #tpu.memory_space<vmem>>, vector<1x8x4xf32>
    %50 = vector.shape_cast %49 : vector<1x8x4xf32> to vector<8x4xf32>
    %51 = vector.shape_cast %48 : vector<8x4xf32> to vector<1x8x4xf32>
    tpu.vector_store %arg10[%c0_29, %c0_30, %c0_31], %51 {strides = array<i32>} : memref<1x8x4xf32, #tpu.memory_space<vmem>>, vector<1x8x4xf32>,
    return
  }
  func.func @transform_0(%arg0: i32, %arg1: i32) -> (i32, i32, i32) {
    %c0_i32 = arith.constant 0 : i32
    %c0_i32_0 = arith.constant 0 : i32
    return %arg0, %c0_i32, %arg1 : i32, i32, i32
  }
  func.func @transform_1(%arg0: i32, %arg1: i32) -> (i32, i32) {
    %c0_i32 = arith.constant 0 : i32
    %c0_i32_0 = arith.constant 0 : i32
    %c0_i32_1 = arith.constant 0 : i32
    return %c0_i32, %c0_i32_0 : i32, i32
  }
  func.func @transform_2(%arg0: i32, %arg1: i32) -> (i32, i32) {
    %c0_i32 = arith.constant 0 : i32
    %c0_i32_0 = arith.constant 0 : i32
    %c0_i32_1 = arith.constant 0 : i32
    return %c0_i32, %c0_i32_0 : i32, i32
  }
  func.func @transform_3(%arg0: i32, %arg1: i32) -> (i32, i32) {
    %c0_i32 = arith.constant 0 : i32
    %c0_i32_0 = arith.constant 0 : i32
    %c0_i32_1 = arith.constant 0 : i32
    return %c0_i32, %c0_i32_0 : i32, i32
  }
  func.func @transform_4(%arg0: i32, %arg1: i32) -> (i32, i32) {
    %c0_i32 = arith.constant 0 : i32
    %c0_i32_0 = arith.constant 0 : i32
    %c0_i32_1 = arith.constant 0 : i32
    return %c0_i32, %c0_i32_0 : i32, i32
  }
  func.func @transform_5(%arg0: i32, %arg1: i32) -> (i32, i32) {
    %c0_i32 = arith.constant 0 : i32
    %c0_i32_0 = arith.constant 0 : i32
    %c0_i32_1 = arith.constant 0 : i32
    return %c0_i32, %c0_i32_0 : i32, i32
  }
  func.func @transform_6(%arg0: i32, %arg1: i32) -> (i32, i32, i32) {
    %c0_i32 = arith.constant 0 : i32
    %c0_i32_0 = arith.constant 0 : i32
    return %arg0, %c0_i32, %arg1 : i32, i32, i32
  }
}

</mosaic_0001>

<bundles_post_ra>
// kernel: tpu_custom_call.1
= control target key start
LH: loop header
LB: loop body
LE: loop exit
PB: predicated region body
PF: predicated region fallthrough
CT: control target
= control target key end

     0   :  { %11 = vsyncpa [#allocation5], 0  ;;  %s1005_s0 = inlined_call_operand.vmem [shape: f32[2,4,128], index: 0, kind: input, shape index: {}]   ;;  %s1006_s1 = inlined_call_operand.vmem [shape: f32[16,12], index: 1, kind: input, shape index: {}]   ;;  %s1007_s2 = inlined_call_operand.vmem [shape: f32[8,1], index: 2, kind: input, shape index: {}]   ;;  %s1008_s3 = inlined_call_operand.vmem [shape: f32[8,24], index: 3, kind: input, shape index: {}]   ;;  %s1009_s4 = inlined_call_operand.vmem [shape: f32[8,1], index: 4, kind: input, shape index: {}]   ;;  %s1010_s5 = inlined_call_operand.vmem [shape: f32[8,1], index: 5, kind: input, shape index: {}]   ;;  %s1011_s6 = inlined_call_operand.hbm [shape: f32[2,8,128], index: 6, kind: output, shape index: {}]  }
   0x1   :  { %13 = vsyncpa [#allocation5 + $0x1], 0  ;;  %s852_s21 = smov 0   ;;  %s854_s22 = smov 0  }
   0x2   :  { %s856_s23 = smov 0   ;;  %s858_s24 = smov 0  }
   0x3   :  { %s860_s25 = smov 0   ;;  %s862_s26 = smov 0  }
   0x4 LB: > { %s600_s27 = sadd.s32 4294967295, %s806_s26   ;;  %s601_s28 = sadd.s32 4294967294, %s806_s26   ;;  %s806_s26 = sphi %s862_s26, %s19_s26   ;;  %s802_s25 = sphi %s860_s25, %s1018_s25   ;;  %s798_s24 = sphi %s858_s24, %s1017_s24   ;;  %s794_s23 = sphi %s856_s23, %s1016_s23   ;;  %s790_s22 = sphi %s854_s22, %s1015_s22   ;;  %s786_s21 = sphi %s852_s21, %s1014_s21  }
   0x5   : > { %s31_s29 = sadd.s32 1, %s802_s25  ;;  %s173_s30 = sadd.s32 1, %s794_s23 }
   0x6   : > { %p33_p0 = scmp.ge.s32.totalorder %s31_s29, 2  ;;  %p183_p1 = scmp.ne.s32.totalorder %s794_s23, %s790_s22 }
   0x7   : > { %p184_p2 = scmp.eq.s32.totalorder %s600_s27, 1  ;;  %p189_p3 = scmp.ne.s32.totalorder %s790_s22, %s786_s21 }
   0x8   : > { %s1020_s29 = smov (%p33_p0, %s31_s29), 0  ;;  %p190_p5 = scmp.eq.s32.totalorder %s601_s28, 1 }
   0x9   : > { %p892_p4 = por %p184_p2, %p183_p1  ;;  %s168_s8 = ssub.s32 %s802_s25, %s1020_s29 }
   0xa   : > { %p604_p6 = scmp.ge.s32.totalorder %s806_s26, 1  ;;  %p171_p7 = scmp.eq.s32.totalorder %s168_s8, 0 }
   0xb   : > { %p899_p8 = por %p190_p5, %p189_p3  ;;  %p233_p9 = scmp.lt.s32.totalorder %s806_s26, 3 }
   0xc   : > { %s905_s10 = scalar_select %p171_p7, %s794_s23, %s173_s30  }
   0xd   : > { %p234_p10 = pnand %p604_p6, %p233_p9 }
   0xe   : > { %p265_p11 = scmp.lt.s32.totalorder (!%p234_p10), %s798_s24, 1  ;;  %vm276_vm0 = vcmask (!%p234_p10), 27648   ;;  %vm278_vm1 = vcmask (!%p234_p10), 31744   ;;  %v808_v0 = vmov (!%p234_p10), 0.0   ;;  %s809_s16 = smov (!%p234_p10), 4   ;;  %v306_v4 = vld [vmem:[%s1006_s1] sm:$0xff] (!%p234_p10) }
   0xf   : > { %237 = sbr.rel (%p234_p10) target bundleno = 968 (0x3c8), region = 44  ;;  %277 = vst.msk [vmem:[#allocation2] sm:$0xf] (!%p234_p10), %vm276_vm0, %v808_v0  ;;  %vm308_vm2 = vcmask (!%p234_p10), 97280   ;;  %s810_s19 = smov (!%p234_p10), 124   ;;  %v811_v10 = vmov (!%p234_p10), 0  }
  0x10   : > { %279 = vst.msk [vmem:[#allocation3] sm:$0xff] (!%p234_p10), %vm278_vm1, %v808_v0  ;;  %627 = vmatprep.mubr.msk.f32.mxu0 (!%p234_p10), %vm308_vm2, %v306_v4  ;;  %727 = vset.pattern.permute.xlu0 (!%p234_p10), %v811_v10  ;;  %v392_v11 = vld [vmem:[%s1007_s2] sm:$0xff] (!%p234_p10)  ;;  %s812_s28 = smov (!%p234_p10), 126   ;;  %vm295_vm3 = vcmask (!%p234_p10), 1031168   ;;  %vm302_vm4 = vcmask (!%p234_p10), 1014784   ;;  %vm304_vm5 = vcmask (!%p234_p10), 1043456  }
  0x11   : > { %721 = vset.pattern.permute.xlu1 (!%p234_p10), %v811_v10  ;;  %vm813_vm6 = vmmov (!%p234_p10), 1   ;;  %v307_v22 = vld [vmem:[%s1006_s1 + $0x8] sm:$0xff] (!%p234_p10)  ;;  %v814_v28 = vmov (!%p234_p10), 0.0|0.0   ;;  %vm815_vm8 = vmmov (!%p234_p10), 0   ;;  %v502_v33 = vld [vmem:[%s1010_s5] sm:$0xff] (!%p234_p10)  ;;  %vm426_vm9 = vcmask (!%p234_p10), 195584  }
  0x12   : > { %vm640_vm7 = vmpackc.low (!%p234_p10), %vm304_vm5, %vm813_vm6  ;;  %645 = vmatprep.subr.bf16.mxu1 (!%p234_p10), %v814_v28  ;;  %636 = vmatprep.mubr.msk.f32.mxu1 (!%p234_p10), %vm815_vm8, %v808_v0  ;;  %v420_v34 = vld [vmem:[%s1009_s4] sm:$0xff] (!%p234_p10)  ;;  %s262_s17 = sand.u32 (!%p234_p10), 1, %s790_s22  }
  0x13   : > { %v419_v42 = vld [vmem:[%s1008_s3] sm:$0xff] (!%p234_p10)  ;;  %s605_s18 = sshll.u32 (!%p234_p10), %s262_s17, 3 }
  0x14   : > { %s264_s20 = scalar_lea.vmem (!%p234_p10), [#allocation4], %s605_s18 }
  0x15   : > { %s529_s27 = sshll.u32 (!%p234_p10), %s264_s20, 4  ;;  %s960_s27 = int_to_ptr.vmem [resolvable:$true] %s529_s27 }
  0x16   : > { %s266_s11 = scalar_select %p265_p11, %s798_s24, 1  ;;  %v281_v2 = vld [vmem:[#allocation2] sm:$0xf] }
  0x17   : > { %v400_v29 = vld [vmem:[#allocation3] sm:$0xff] }
  0x18   : > { %s606_s12 = sshll.u32 %s266_s11, 2  ;;  %s515_s11 = scalar_lea.sflag [#allocation5], %s262_s17 }
  0x19   : > { %s271_s15 = scalar_lea.vmem %s1005_s0, %s606_s12  ;;  %s728_s12 = scalar_lea.vmem %s960_s27, 128 }
  0x1a   : > { %v280_v1 = vld [vmem:[%s271_s15] sm:$0xf]  ;;  %p729_p12 = scmp.ne.s32.totalorder %s960_s27, %s728_s12 }
  0x1b   : > { %283 = vrot.lane.b32.xlu0 %v280_v1, %s809_s16 }
  0x1c   : > { %p730_p13 = pnand %p729_p12, %p892_p4 }
  0x1e   : > { %p731_p0 = pneg %p730_p13 }
  0x8d   : > { %v284_v3 = vpop.permute.xlu0 %283 }
  0x8e   : > { %v290_v5 = vrot.slane %v284_v3, 4  ;;  %512 = vst.msk [vmem:[#allocation2] sm:$0xf] %vm276_vm0, %v284_v3  ;;  %v287_v6 = vsel %vm278_vm1, %v281_v2, %v284_v3 }
  0x8f   : > { %v716_v7 = vpack.i.bf16 %v284_v3, %v287_v6  ;;  %v289_v8 = vrot.slane %v287_v6, 4 }
  0x91   : > { %717 = vrot.lane.b32.xlu1 %v716_v7, %s810_s19  ;;  %v711_v9 = vpack.i.bf16 %v290_v5, %v289_v8 }
  0x93   : > { %712 = vrot.lane.b32.xlu0 %v711_v9, %s812_s28 }
  0x95   : > { %395 = vperm.xlu1 %721, %v392_v11  }
 0x103   : > { %v718_v12 = vpop.permute.xlu1 %717 }
 0x104   : > { %v720_v13 = vunpack.i.h.bf16 %v718_v12  ;;  %v719_v14 = vunpack.i.l.bf16 %v718_v12 }
 0x105   : > { %v713_v15 = vpop.permute.xlu0 %712 }
 0x106   : > { %v715_v16 = vunpack.i.h.bf16 %v713_v15  ;;  %v714_v17 = vunpack.i.l.bf16 %v713_v15  ;;  %v303_v19 = vsel %vm302_vm4, %v719_v14, %v720_v13 }
 0x108   : > { %v296_v18 = vsel %vm295_vm3, %v714_v17, %v715_v16 }
 0x109   : > { %v305_v20 = vsel %vm304_vm5, %v287_v6, %v296_v18 }
 0x10a   : > { %v639_v21 = vpack.c.bf16 %v303_v19, %v305_v20 }
 0x10c   : > { %641 = vmatprep.subr.msk.bf16.mxu0 %vm640_vm7, %v639_v21 }
 0x10d   : > { %644 = vmatpush3.bf16.msk.msra.mxu0 %vm640_vm7, %v639_v21 }
 0x110   : > { %628 = vmatmul.mubr.msk.f32.vlgmr.msra.gmra.mrb[0].mxu0 %vm308_vm2, %v307_v22 }
 0x114   : > { %v396_v23 = vpop.permute.xlu1 %395 }
 0x1e3   : > { %v629_v24 = vpop.f32.mrb[0].mxu0 }
 0x1e4   : > { %v383_v25 = vpop.f32.mrb[1].mxu0 }
 0x1e5   : > { %v398_v26 = vadd.f32 %v396_v23, %v383_v25 }
 0x1e7   : > { %v399_v27 = vmax.f32 %v398_v26, 0.0 }
 0x1e9   : > { %402 = vrot.lane.b32.xlu0 %v399_v27, %s809_s16 }
 0x25b   : > { %v403_v30 = vpop.permute.xlu0 %402 }
 0x25c   : > { %v405_v31 = vsel %vm278_vm1, %v400_v29, %v403_v30  ;;  %513 = vst.msk [vmem:[#allocation3] sm:$0xff] %vm278_vm1, %v403_v30 }
 0x25d   : > { %413 = vrot.lane.b32.xlu0 %v405_v31, %s810_s19  ;;  %v722_v32 = vpack.i.bf16 %v403_v30, %v405_v31 }
 0x25f   : > { %723 = vrot.lane.b32.xlu1 %v722_v32, %s812_s28 }
 0x261   : > { %423 = vperm.xlu0 %727, %v420_v34  }
 0x263   : > { %415 = vrot.lane.b32.xlu1 %v403_v30, %s810_s19  ;;  %s612_s19 = sshll.u32 %s798_s24, 7  ;;  %s816_s24 = smov [#allocation4]  }
 0x264   : > { %s958_s8 = scalar_lea.hbm %s1011_s6, %s612_s19  ;;  %s732_s13 = sshll.u32 %s816_s24, 4  ;;  %s733_s13 = int_to_ptr.vmem [resolvable:$false] %s732_s13 }
 0x265   : > { %s734_s14 = scalar_lea.vmem %s733_s13, 256  ;;  %p735_p1 = scmp.lt.s32.totalorder %s960_s27, %s733_s13 }
 0x266   : > { %p736_p2 = scmp.lt.s32.totalorder %s734_s14, %s728_s12 }
 0x267   : > { %505 = vperm.xlu1 %721, %v502_v33  }
 0x268   : > { %p737_p3 = por %p736_p2, %p735_p1 }
 0x26a   : > { %p738_p5 = pnand %p737_p3, %p731_p0 }
 0x2cf   : > { %v414_v41 = vpop.permute.xlu0 %413 }
 0x2d1   : > { %v724_v35 = vpop.permute.xlu1 %723 }
 0x2d2   : > { %v726_v36 = vunpack.i.h.bf16 %v724_v35  ;;  %v725_v37 = vunpack.i.l.bf16 %v724_v35 }
 0x2d4   : > { %v411_v38 = vsel %vm295_vm3, %v725_v37, %v726_v36 }
 0x2d5   : > { %v646_v39 = vpack.c.bf16 %v411_v38, %v405_v31  ;;  %v416_v40 = vpop.permute.xlu1 %415 }
 0x2d6   : > { %v417_v43 = vsel %vm302_vm4, %v414_v41, %v416_v40 }
 0x2d7   : > { %647 = vmatpush3.bf16.msra.mxu1 %v646_v39 }
 0x2d8   : > { %634 = vmatprep.subr.mxu1 %v808_v0 }
 0x2db   : > { %635 = vmatpush3.msra.mxu1 %v417_v43 }
 0x2dc   : > { %637 = vmatmul.mubr.msk.f32.vlgmr.msra.gmra.mrb[0].mxu1 %vm426_vm9, %v419_v42 }
 0x2e0   : > { %v424_v44 = vpop.permute.xlu0 %423 }
 0x2e6   : > { %v506_v50 = vpop.permute.xlu1 %505 }
 0x3af   : > { %v496_v45 = vpop.f32.mrb[0].mxu1 }
 0x3b0   : > { %v497_v46 = vadd.f32 %v496_v45, %v424_v44  ;;  %v638_v47 = vpop.f32.mrb[1].mxu1 }
 0x3b2   : > { %v500_v48 = vmax.f32 %v497_v46, 0.0 }
 0x3b4   : > { %v501_v49 = vadd.f32 %v629_v24, %v500_v48 }
 0x3b6   : > { %v508_v51 = vadd.f32 %v506_v50, %v501_v49 }
 0x3b8   : > { %v509_v52 = vmax.f32 %v508_v51, 0.0 }
 0x3ba   : > { %510 = vst [vmem:[%s264_s20] sm:$0xff] %v509_v52 }
 0x3bb   : > { %741 = shalt.err (!%p738_p5)
}
 0x3bc   : > { %s742_s15 = scalar_lea.hbm %s958_s8, 128  ;;  %s746_s18 = scalar_lea.hbm %s1011_s6, 256 }
 0x3bd   : > { %p743_p6 = scmp.ne.s32.totalorder %s958_s8, %s742_s15  ;;  %p747_p10 = scmp.lt.u32.totalorder %s958_s8, %s1011_s6 }
 0x3be   : > { %p748_p11 = scmp.lt.u32.totalorder %s746_s18, %s742_s15  ;;  %p750_p13 = scmp.lt.u32.totalorder %s742_s15, %s958_s8 }
 0x3bf   : > { %p744_p7 = pnand %p743_p6, %p892_p4 }
 0x3c0   : > { %p749_p12 = por %p748_p11, %p747_p10 }
 0x3c1   : > { %p745_p9 = pneg %p744_p7 }
 0x3c2   : > { %p751_p0 = por %p750_p13, %p749_p12 }
 0x3c4   : > { %p752_p1 = pnand %p751_p0, %p745_p9 }
 0x3c6   : > { %755 = shalt.err (!%p752_p1)
}
 0x3c7   : > { %648 = dma.vmem_to_hbm [thread:$0]  (%p892_p4), %s960_s27, 128, %s958_s8, %s515_s11  }
 0x3c8 PF: > { %p654_p2 = scmp.ge.s32.totalorder %s806_s26, 2  ;;  %s541_s28 = sand.u32 1, %s786_s21  }
 0x3c9   : > { %s542_s30 = scalar_lea.sflag [#allocation5], %s541_s28 }
 0x3ca   : > { %p651_p3 = pnand %p654_p2, %p899_p8 }
 0x3cc   : > { %781 = dma.done.wait (!%p651_p3), %s542_s30, 128  }
 0x3cd   : > { %783 = vsyncadd (!%p651_p3), %s542_s30, 4294967168  ;;  %s19_s26 = sadd.s32 1, %s806_s26   ;;  %s1014_s21 = smov %s790_s22 }
 0x3ce   : > { %p16_p5 = scmp.ge.s32.totalorder %s19_s26, 4   ;;  %s1015_s22 = smov %s794_s23 }
 0x3cf   : > { %s1016_s23 = smov %s905_s10  ;;  %s1017_s24 = smov %s802_s25 }
 0x3d0   : > { %s1018_s25 = smov %s1020_s29  ;;  %18 = sbr.rel (!%p16_p5) target bundleno = 4 (0x4), region = 83 }
 0x3d7   :  { %547 = vsyncpa [#allocation5], 1 }
 0x3d8   :  { %549 = vsyncpa [#allocation5 + $0x1], 1 }

</bundles_post_ra>
